<compile_context>
chip_gen: v6e
topology: v6e:2x2x1
jax: 0.10.0
libtpu: 0.0.40
codegen_flags: <defaults>
</compile_context>

<pallas_src>
import jax
import jax.numpy as jnp
from jax.experimental import pallas as pl
from jax.experimental.pallas import tpu as pltpu


def _make_pixel_shuffle_kernel(r, c_tile, H, W, caffe_mode, out_dtype):
    h, w = H * r, W * r

    def kernel(x_ref, o_ref):
        # Constant 0/1 dilation ("scatter") matrices built from 2-D iota.
        #   S[r2]: (W, w) with S[j, j*r + r2] = 1  -> spreads columns (lanes).
        #   T[r1]: (h, H) with T[i*r + r1, i] = 1  -> spreads rows (sublanes).
        jW = jax.lax.broadcasted_iota(jnp.int32, (W, w), 0)
        kW = jax.lax.broadcasted_iota(jnp.int32, (W, w), 1)
        S = [jnp.where(kW == jW * r + r2, 1.0, 0.0) for r2 in range(r)]
        pH = jax.lax.broadcasted_iota(jnp.int32, (h, H), 0)
        iH = jax.lax.broadcasted_iota(jnp.int32, (h, H), 1)
        T = [jnp.where(pH == iH * r + r1, 1.0, 0.0) for r1 in range(r)]

        for ct in range(c_tile):
            acc = jnp.zeros((h, w), jnp.float32)
            for r1 in range(r):
                # Source planes that feed output rows congruent to r1 (mod r).
                planes = []
                for r2 in range(r):
                    q = r1 * r + r2
                    p = x_ref[0, q, ct] if caffe_mode else x_ref[0, ct, q]
                    planes.append(p.astype(jnp.float32))
                # Three bf16-exact passes: value = hi + mid + lo, every part
                # exactly bf16-representable -> part @ {0,1} matrix is exact,
                # and the f32 sums rebuild the original f32 bit-exactly.
                for _ in range(3):
                    m = jnp.zeros((H, w), jnp.float32)
                    nxt = []
                    for r2 in range(r):
                        part = planes[r2].astype(jnp.bfloat16).astype(jnp.float32)
                        nxt.append(planes[r2] - part)
                        m = m + jnp.dot(part, S[r2],
                                        preferred_element_type=jnp.float32)
                    planes = nxt
                    acc = acc + jnp.dot(T[r1], m,
                                        preferred_element_type=jnp.float32)
            o_ref[0, ct] = acc.astype(out_dtype)

    return kernel


def pixel_shuffle_align(x, upscale_factor=2, mode="caffe"):
    if x.ndim != 4:
        raise ValueError(f"input tensor shape {x.shape} is not supported.")
    if mode not in ("caffe", "pytorch"):
        raise NotImplementedError(f"{mode} mode is not implemented")
    N, C, H, W = x.shape
    r = int(upscale_factor)
    if C % (r * r) != 0:
        raise ValueError("C must be divisible by upscale_factor**2")
    c = C // (r * r)
    h, w = H * r, W * r

    # Channel tile: largest divisor of c not exceeding 8 (keeps the unrolled
    # per-step channel loop and VMEM blocks small; no ragged edge blocks).
    c_tile = 1
    for d in range(min(c, 8), 0, -1):
        if c % d == 0:
            c_tile = d
            break

    caffe_mode = mode == "caffe"
    if caffe_mode:
        xv = x.reshape(N, r * r, c, H, W)            # free (contiguous) view
        in_block = (1, r * r, c_tile, H, W)
        in_map = lambda n, cb: (n, 0, cb, 0, 0)
    else:
        xv = x.reshape(N, c, r * r, H, W)            # free (contiguous) view
        in_block = (1, c_tile, r * r, H, W)
        in_map = lambda n, cb: (n, cb, 0, 0, 0)

    kernel = _make_pixel_shuffle_kernel(r, c_tile, H, W, caffe_mode, x.dtype)

    return pl.pallas_call(
        kernel,
        out_shape=jax.ShapeDtypeStruct((N, c, h, w), x.dtype),
        grid=(N, c // c_tile),
        in_specs=[pl.BlockSpec(in_block, in_map)],
        out_specs=pl.BlockSpec((1, c_tile, h, w), lambda n, cb: (n, cb, 0, 0)),
        compiler_params=pltpu.CompilerParams(
            dimension_semantics=("parallel", "parallel"),
            vmem_limit_bytes=32 * 1024 * 1024,
        ),
    )(xv)


def pixel_shuffle_ref(x, upscale_factor=2, mode="caffe"):
    """Pure-JAX reference mirroring the PyTorch module."""
    N, C, H, W = x.shape
    r = upscale_factor
    c = C // (r * r)
    if mode == "caffe":
        y = x.reshape(N, r, r, c, H, W).transpose(0, 3, 4, 1, 5, 2)
    else:
        y = x.reshape(N, c, r, r, H, W).transpose(0, 1, 4, 2, 5, 3)
    return y.reshape(N, c, H * r, W * r)


if __name__ == "__main__":
    key = jax.random.PRNGKey(0)
    k1, k2 = jax.random.split(key)

    # Module defaults: upscale_factor=2, mode='caffe'.
    N, C, H, W = 2, 4, 16, 16
    r = 2
    x = jax.random.normal(k1, (N, C, H, W), jnp.float32)

    fwd = jax.jit(lambda a: pixel_shuffle_align(a, upscale_factor=r, mode="caffe"))
    out = jax.block_until_ready(fwd(x))
    ref = pixel_shuffle_ref(x, r, "caffe")
    assert out.shape == (N, C // (r * r), H * r, W * r)
    assert jnp.allclose(out, ref, atol=1e-6, rtol=1e-6)

    # Also exercise 'pytorch' mode with more than one output channel.
    x2 = jax.random.normal(k2, (2, 8, 16, 16), jnp.float32)
    fwd_pt = jax.jit(lambda a: pixel_shuffle_align(a, upscale_factor=r, mode="pytorch"))
    out2 = jax.block_until_ready(fwd_pt(x2))
    ref2 = pixel_shuffle_ref(x2, r, "pytorch")
    assert out2.shape == (2, 2, 32, 32)
    assert jnp.allclose(out2, ref2, atol=1e-6, rtol=1e-6)

    print("KERNEL_OK")
</pallas_src>

<mosaic_0001>
module attributes {stable_mosaic.version = 11 : i64} {
  func.func @kernel(%arg0: i32, %arg1: i32, %arg2: memref<1x4x1x16x16xf32, #tpu.memory_space<vmem>>, %arg3: memref<1x1x32x32xf32, #tpu.memory_space<vmem>>) attributes {dimension_semantics = [#tpu.dimension_semantics<parallel>, #tpu.dimension_semantics<parallel>], iteration_bounds = array<i64: 2, 1>, scalar_prefetch = 0 : i64, scratch_operands = 0 : i64, tpu.core_type = #tpu.core_type<tc>, window_params = [{transform_indices = @transform_0, window_bounds = array<i64: 1, 4, 1, 16, 16>}, {transform_indices = @transform_1, window_bounds = array<i64: 1, 1, 32, 32>}]} {
    %0 = tpu.iota {dimensions = array<i32: 0>} : vector<16x32xi32>
    %1 = tpu.iota {dimensions = array<i32: 1>} : vector<16x32xi32>
    %c2_i32 = arith.constant 2 : i32
    %2 = vector.broadcast %c2_i32 : i32 to vector<16x32xi32>
    %3 = arith.muli %0, %2 : vector<16x32xi32>
    %c0_i32 = arith.constant 0 : i32
    %4 = vector.broadcast %c0_i32 : i32 to vector<16x32xi32>
    %5 = arith.addi %3, %4 : vector<16x32xi32>
    %6 = arith.cmpi eq, %1, %5 : vector<16x32xi32>
    %cst = arith.constant 1.000000e+00 : f32
    %cst_0 = arith.constant 0.000000e+00 : f32
    %7 = vector.broadcast %cst : f32 to vector<16x32xf32>
    %8 = vector.broadcast %cst_0 : f32 to vector<16x32xf32>
    %9 = arith.select %6, %7, %8 : vector<16x32xi1>, vector<16x32xf32>
    %c2_i32_1 = arith.constant 2 : i32
    %10 = vector.broadcast %c2_i32_1 : i32 to vector<16x32xi32>
    %11 = arith.muli %0, %10 : vector<16x32xi32>
    %c1_i32 = arith.constant 1 : i32
    %12 = vector.broadcast %c1_i32 : i32 to vector<16x32xi32>
    %13 = arith.addi %11, %12 : vector<16x32xi32>
    %14 = arith.cmpi eq, %1, %13 : vector<16x32xi32>
    %cst_2 = arith.constant 1.000000e+00 : f32
    %cst_3 = arith.constant 0.000000e+00 : f32
    %15 = vector.broadcast %cst_2 : f32 to vector<16x32xf32>
    %16 = vector.broadcast %cst_3 : f32 to vector<16x32xf32>
    %17 = arith.select %14, %15, %16 : vector<16x32xi1>, vector<16x32xf32>
    %18 = tpu.iota {dimensions = array<i32: 0>} : vector<32x16xi32>
    %19 = tpu.iota {dimensions = array<i32: 1>} : vector<32x16xi32>
    %c2_i32_4 = arith.constant 2 : i32
    %20 = vector.broadcast %c2_i32_4 : i32 to vector<32x16xi32>
    %21 = arith.muli %19, %20 : vector<32x16xi32>
    %c0_i32_5 = arith.constant 0 : i32
    %22 = vector.broadcast %c0_i32_5 : i32 to vector<32x16xi32>
    %23 = arith.addi %21, %22 : vector<32x16xi32>
    %24 = arith.cmpi eq, %18, %23 : vector<32x16xi32>
    %cst_6 = arith.constant 1.000000e+00 : f32
    %cst_7 = arith.constant 0.000000e+00 : f32
    %25 = vector.broadcast %cst_6 : f32 to vector<32x16xf32>
    %26 = vector.broadcast %cst_7 : f32 to vector<32x16xf32>
    %27 = arith.select %24, %25, %26 : vector<32x16xi1>, vector<32x16xf32>
    %c2_i32_8 = arith.constant 2 : i32
    %28 = vector.broadcast %c2_i32_8 : i32 to vector<32x16xi32>
    %29 = arith.muli %19, %28 : vector<32x16xi32>
    %c1_i32_9 = arith.constant 1 : i32
    %30 = vector.broadcast %c1_i32_9 : i32 to vector<32x16xi32>
    %31 = arith.addi %29, %30 : vector<32x16xi32>
    %32 = arith.cmpi eq, %18, %31 : vector<32x16xi32>
    %cst_10 = arith.constant 1.000000e+00 : f32
    %cst_11 = arith.constant 0.000000e+00 : f32
    %33 = vector.broadcast %cst_10 : f32 to vector<32x16xf32>
    %34 = vector.broadcast %cst_11 : f32 to vector<32x16xf32>
    %35 = arith.select %32, %33, %34 : vector<32x16xi1>, vector<32x16xf32>
    %cst_12 = arith.constant 0.000000e+00 : f32
    %36 = vector.broadcast %cst_12 : f32 to vector<32x32xf32>
    %c0 = arith.constant 0 : index
    %c0_13 = arith.constant 0 : index
    %c0_14 = arith.constant 0 : index
    %c0_15 = arith.constant 0 : index
    %c0_16 = arith.constant 0 : index
    %37 = vector.load %arg2[%c0, %c0_13, %c0_14, %c0_15, %c0_16] : memref<1x4x1x16x16xf32, #tpu.memory_space<vmem>>, vector<1x1x1x16x16xf32>
    %38 = vector.shape_cast %37 : vector<1x1x1x16x16xf32> to vector<16x16xf32>
    %c0_17 = arith.constant 0 : index
    %c1 = arith.constant 1 : index
    %c0_18 = arith.constant 0 : index
    %c0_19 = arith.constant 0 : index
    %c0_20 = arith.constant 0 : index
    %39 = vector.load %arg2[%c0_17, %c1, %c0_18, %c0_19, %c0_20] : memref<1x4x1x16x16xf32, #tpu.memory_space<vmem>>, vector<1x1x1x16x16xf32>
    %40 = vector.shape_cast %39 : vector<1x1x1x16x16xf32> to vector<16x16xf32>
    %cst_21 = arith.constant 0.000000e+00 : f32
    %41 = vector.broadcast %cst_21 : f32 to vector<16x32xf32>
    %42 = arith.truncf %38 : vector<16x16xf32> to vector<16x16xbf16>
    %43 = arith.extf %42 : vector<16x16xbf16> to vector<16x16xf32>
    %44 = arith.subf %38, %43 : vector<16x16xf32>
    %cst_22 = arith.constant dense<0.000000e+00> : vector<16x32xf32>
    %45 = tpu.matmul %43, %9, %cst_22 {dimension_numbers = #tpu.dot_dimension_numbers<[1], [0], [0], [1], [0, 0, 1, 1], [], []>} : vector<16x16xf32>, vector<16x32xf32>, vector<16x32xf32> -> vector<16x32xf32>
    %46 = arith.addf %41, %45 : vector<16x32xf32>
    %47 = arith.truncf %40 : vector<16x16xf32> to vector<16x16xbf16>
    %48 = arith.extf %47 : vector<16x16xbf16> to vector<16x16xf32>
    %49 = arith.subf %40, %48 : vector<16x16xf32>
    %cst_23 = arith.constant dense<0.000000e+00> : vector<16x32xf32>
    %50 = tpu.matmul %48, %17, %cst_23 {dimension_numbers = #tpu.dot_dimension_numbers<[1], [0], [0], [1], [0, 0, 1, 1], [], []>} : vector<16x16xf32>, vector<16x32xf32>, vector<16x32xf32> -> vector<16x32xf32>
    %51 = arith.addf %46, %50 : vector<16x32xf32>
    %cst_24 = arith.constant dense<0.000000e+00> : vector<32x32xf32>
    %52 = tpu.matmul %27, %51, %cst_24 {dimension_numbers = #tpu.dot_dimension_numbers<[1], [0], [0], [1], [0, 0, 1, 1], [], []>} : vector<32x16xf32>, vector<16x32xf32>, vector<32x32xf32> -> vector<32x32xf32>
    %53 = arith.addf %36, %52 : vector<32x32xf32>
    %cst_25 = arith.constant 0.000000e+00 : f32
    %54 = vector.broadcast %cst_25 : f32 to vector<16x32xf32>
    %55 = arith.truncf %44 : vector<16x16xf32> to vector<16x16xbf16>
    %56 = arith.extf %55 : vector<16x16xbf16> to vector<16x16xf32>
    %57 = arith.subf %44, %56 : vector<16x16xf32>
    %cst_26 = arith.constant dense<0.000000e+00> : vector<16x32xf32>
    %58 = tpu.matmul %56, %9, %cst_26 {dimension_numbers = #tpu.dot_dimension_numbers<[1], [0], [0], [1], [0, 0, 1, 1], [], []>} : vector<16x16xf32>, vector<16x32xf32>, vector<16x32xf32> -> vector<16x32xf32>
    %59 = arith.addf %54, %58 : vector<16x32xf32>
    %60 = arith.truncf %49 : vector<16x16xf32> to vector<16x16xbf16>
    %61 = arith.extf %60 : vector<16x16xbf16> to vector<16x16xf32>
    %62 = arith.subf %49, %61 : vector<16x16xf32>
    %cst_27 = arith.constant dense<0.000000e+00> : vector<16x32xf32>
    %63 = tpu.matmul %61, %17, %cst_27 {dimension_numbers = #tpu.dot_dimension_numbers<[1], [0], [0], [1], [0, 0, 1, 1], [], []>} : vector<16x16xf32>, vector<16x32xf32>, vector<16x32xf32> -> vector<16x32xf32>
    %64 = arith.addf %59, %63 : vector<16x32xf32>
    %cst_28 = arith.constant dense<0.000000e+00> : vector<32x32xf32>
    %65 = tpu.matmul %27, %64, %cst_28 {dimension_numbers = #tpu.dot_dimension_numbers<[1], [0], [0], [1], [0, 0, 1, 1], [], []>} : vector<32x16xf32>, vector<16x32xf32>, vector<32x32xf32> -> vector<32x32xf32>
    %66 = arith.addf %53, %65 : vector<32x32xf32>
    %cst_29 = arith.constant 0.000000e+00 : f32
    %67 = vector.broadcast %cst_29 : f32 to vector<16x32xf32>
    %68 = arith.truncf %57 : vector<16x16xf32> to vector<16x16xbf16>
    %69 = arith.extf %68 : vector<16x16xbf16> to vector<16x16xf32>
    %cst_30 = arith.constant dense<0.000000e+00> : vector<16x32xf32>
    %70 = tpu.matmul %69, %9, %cst_30 {dimension_numbers = #tpu.dot_dimension_numbers<[1], [0], [0], [1], [0, 0, 1, 1], [], []>} : vector<16x16xf32>, vector<16x32xf32>, vector<16x32xf32> -> vector<16x32xf32>
    %71 = arith.addf %67, %70 : vector<16x32xf32>
    %72 = arith.truncf %62 : vector<16x16xf32> to vector<16x16xbf16>
    %73 = arith.extf %72 : vector<16x16xbf16> to vector<16x16xf32>
    %cst_31 = arith.constant dense<0.000000e+00> : vector<16x32xf32>
    %74 = tpu.matmul %73, %17, %cst_31 {dimension_numbers = #tpu.dot_dimension_numbers<[1], [0], [0], [1], [0, 0, 1, 1], [], []>} : vector<16x16xf32>, vector<16x32xf32>, vector<16x32xf32> -> vector<16x32xf32>
    %75 = arith.addf %71, %74 : vector<16x32xf32>
    %cst_32 = arith.constant dense<0.000000e+00> : vector<32x32xf32>
    %76 = tpu.matmul %27, %75, %cst_32 {dimension_numbers = #tpu.dot_dimension_numbers<[1], [0], [0], [1], [0, 0, 1, 1], [], []>} : vector<32x16xf32>, vector<16x32xf32>, vector<32x32xf32> -> vector<32x32xf32>
    %77 = arith.addf %66, %76 : vector<32x32xf32>
    %c0_33 = arith.constant 0 : index
    %c2 = arith.constant 2 : index
    %c0_34 = arith.constant 0 : index
    %c0_35 = arith.constant 0 : index
    %c0_36 = arith.constant 0 : index
    %78 = vector.load %arg2[%c0_33, %c2, %c0_34, %c0_35, %c0_36] : memref<1x4x1x16x16xf32, #tpu.memory_space<vmem>>, vector<1x1x1x16x16xf32>
    %79 = vector.shape_cast %78 : vector<1x1x1x16x16xf32> to vector<16x16xf32>
    %c0_37 = arith.constant 0 : index
    %c3 = arith.constant 3 : index
    %c0_38 = arith.constant 0 : index
    %c0_39 = arith.constant 0 : index
    %c0_40 = arith.constant 0 : index
    %80 = vector.load %arg2[%c0_37, %c3, %c0_38, %c0_39, %c0_40] : memref<1x4x1x16x16xf32, #tpu.memory_space<vmem>>, vector<1x1x1x16x16xf32>
    %81 = vector.shape_cast %80 : vector<1x1x1x16x16xf32> to vector<16x16xf32>
    %cst_41 = arith.constant 0.000000e+00 : f32
    %82 = vector.broadcast %cst_41 : f32 to vector<16x32xf32>
    %83 = arith.truncf %79 : vector<16x16xf32> to vector<16x16xbf16>
    %84 = arith.extf %83 : vector<16x16xbf16> to vector<16x16xf32>
    %85 = arith.subf %79, %84 : vector<16x16xf32>
    %cst_42 = arith.constant dense<0.000000e+00> : vector<16x32xf32>
    %86 = tpu.matmul %84, %9, %cst_42 {dimension_numbers = #tpu.dot_dimension_numbers<[1], [0], [0], [1], [0, 0, 1, 1], [], []>} : vector<16x16xf32>, vector<16x32xf32>, vector<16x32xf32> -> vector<16x32xf32>
    %87 = arith.addf %82, %86 : vector<16x32xf32>
    %88 = arith.truncf %81 : vector<16x16xf32> to vector<16x16xbf16>
    %89 = arith.extf %88 : vector<16x16xbf16> to vector<16x16xf32>
    %90 = arith.subf %81, %89 : vector<16x16xf32>
    %cst_43 = arith.constant dense<0.000000e+00> : vector<16x32xf32>
    %91 = tpu.matmul %89, %17, %cst_43 {dimension_numbers = #tpu.dot_dimension_numbers<[1], [0], [0], [1], [0, 0, 1, 1], [], []>} : vector<16x16xf32>, vector<16x32xf32>, vector<16x32xf32> -> vector<16x32xf32>
    %92 = arith.addf %87, %91 : vector<16x32xf32>
    %cst_44 = arith.constant dense<0.000000e+00> : vector<32x32xf32>
    %93 = tpu.matmul %35, %92, %cst_44 {dimension_numbers = #tpu.dot_dimension_numbers<[1], [0], [0], [1], [0, 0, 1, 1], [], []>} : vector<32x16xf32>, vector<16x32xf32>, vector<32x32xf32> -> vector<32x32xf32>
    %94 = arith.addf %77, %93 : vector<32x32xf32>
    %cst_45 = arith.constant 0.000000e+00 : f32
    %95 = vector.broadcast %cst_45 : f32 to vector<16x32xf32>
    %96 = arith.truncf %85 : vector<16x16xf32> to vector<16x16xbf16>
    %97 = arith.extf %96 : vector<16x16xbf16> to vector<16x16xf32>
    %98 = arith.subf %85, %97 : vector<16x16xf32>
    %cst_46 = arith.constant dense<0.000000e+00> : vector<16x32xf32>
    %99 = tpu.matmul %97, %9, %cst_46 {dimension_numbers = #tpu.dot_dimension_numbers<[1], [0], [0], [1], [0, 0, 1, 1], [], []>} : vector<16x16xf32>, vector<16x32xf32>, vector<16x32xf32> -> vector<16x32xf32>
    %100 = arith.addf %95, %99 : vector<16x32xf32>
    %101 = arith.truncf %90 : vector<16x16xf32> to vector<16x16xbf16>
    %102 = arith.extf %101 : vector<16x16xbf16> to vector<16x16xf32>
    %103 = arith.subf %90, %102 : vector<16x16xf32>
    %cst_47 = arith.constant dense<0.000000e+00> : vector<16x32xf32>
    %104 = tpu.matmul %102, %17, %cst_47 {dimension_numbers = #tpu.dot_dimension_numbers<[1], [0], [0], [1], [0, 0, 1, 1], [], []>} : vector<16x16xf32>, vector<16x32xf32>, vector<16x32xf32> -> vector<16x32xf32>
    %105 = arith.addf %100, %104 : vector<16x32xf32>
    %cst_48 = arith.constant dense<0.000000e+00> : vector<32x32xf32>
    %106 = tpu.matmul %35, %105, %cst_48 {dimension_numbers = #tpu.dot_dimension_numbers<[1], [0], [0], [1], [0, 0, 1, 1], [], []>} : vector<32x16xf32>, vector<16x32xf32>, vector<32x32xf32> -> vector<32x32xf32>
    %107 = arith.addf %94, %106 : vector<32x32xf32>
    %cst_49 = arith.constant 0.000000e+00 : f32
    %108 = vector.broadcast %cst_49 : f32 to vector<16x32xf32>
    %109 = arith.truncf %98 : vector<16x16xf32> to vector<16x16xbf16>
    %110 = arith.extf %109 : vector<16x16xbf16> to vector<16x16xf32>
    %cst_50 = arith.constant dense<0.000000e+00> : vector<16x32xf32>
    %111 = tpu.matmul %110, %9, %cst_50 {dimension_numbers = #tpu.dot_dimension_numbers<[1], [0], [0], [1], [0, 0, 1, 1], [], []>} : vector<16x16xf32>, vector<16x32xf32>, vector<16x32xf32> -> vector<16x32xf32>
    %112 = arith.addf %108, %111 : vector<16x32xf32>
    %113 = arith.truncf %103 : vector<16x16xf32> to vector<16x16xbf16>
    %114 = arith.extf %113 : vector<16x16xbf16> to vector<16x16xf32>
    %cst_51 = arith.constant dense<0.000000e+00> : vector<16x32xf32>
    %115 = tpu.matmul %114, %17, %cst_51 {dimension_numbers = #tpu.dot_dimension_numbers<[1], [0], [0], [1], [0, 0, 1, 1], [], []>} : vector<16x16xf32>, vector<16x32xf32>, vector<16x32xf32> -> vector<16x32xf32>
    %116 = arith.addf %112, %115 : vector<16x32xf32>
    %cst_52 = arith.constant dense<0.000000e+00> : vector<32x32xf32>
    %117 = tpu.matmul %35, %116, %cst_52 {dimension_numbers = #tpu.dot_dimension_numbers<[1], [0], [0], [1], [0, 0, 1, 1], [], []>} : vector<32x16xf32>, vector<16x32xf32>, vector<32x32xf32> -> vector<32x32xf32>
    %118 = arith.addf %107, %117 : vector<32x32xf32>
    %c0_53 = arith.constant 0 : index
    %c0_54 = arith.constant 0 : index
    %c0_55 = arith.constant 0 : index
    %c0_56 = arith.constant 0 : index
    %119 = vector.load %arg3[%c0_53, %c0_54, %c0_55, %c0_56] : memref<1x1x32x32xf32, #tpu.memory_space<vmem>>, vector<1x1x32x32xf32>
    %120 = vector.shape_cast %119 : vector<1x1x32x32xf32> to vector<32x32xf32>
    %121 = vector.shape_cast %118 : vector<32x32xf32> to vector<1x1x32x32xf32>
    tpu.vector_store %arg3[%c0_53, %c0_54, %c0_55, %c0_56], %121 {strides = array<i32>} : memref<1x1x32x32xf32, #tpu.memory_space<vmem>>, vector<1x1x32x32xf32>,
    return
  }
  func.func @transform_0(%arg0: i32, %arg1: i32) -> (i32, i32, i32, i32, i32) {
    %c0_i32 = arith.constant 0 : i32
    %c0_i32_0 = arith.constant 0 : i32
    %c0_i32_1 = arith.constant 0 : i32
    %c0_i32_2 = arith.constant 0 : i32
    return %arg0, %c0_i32, %arg1, %c0_i32_0, %c0_i32_1 : i32, i32, i32, i32, i32
  }
  func.func @transform_1(%arg0: i32, %arg1: i32) -> (i32, i32, i32, i32) {
    %c0_i32 = arith.constant 0 : i32
    %c0_i32_0 = arith.constant 0 : i32
    %c0_i32_1 = arith.constant 0 : i32
    return %arg0, %arg1, %c0_i32, %c0_i32_0 : i32, i32, i32, i32
  }
}

</mosaic_0001>

<bundles_post_ra>
// kernel: _lambda_.1
= control target key start
LH: loop header
LB: loop body
LE: loop exit
PB: predicated region body
PF: predicated region fallthrough
CT: control target
= control target key end

     0   :  { %6 = vsyncpa [#allocation3], 0  ;;  %s2857_s0 = inlined_call_operand.hbm [shape: f32[2,4,1,16,16], index: 0, kind: input, shape index: {}]   ;;  %s2858_s1 = inlined_call_operand.hbm [shape: f32[2,1,32,32], index: 1, kind: output, shape index: {}]  }
   0x1   :  { %8 = vsyncpa [#allocation3 + $0x1], 0 }
   0x2   :  { %9 = vsyncpa [#allocation4], 0 }
   0x3   :  { %11 = vsyncpa [#allocation4 + $0x1], 0  ;;  %s2403_s6 = smov 0   ;;  %s2405_s7 = smov 0  }
   0x4   :  { %s2407_s8 = smov 0   ;;  %s2409_s9 = smov 0  }
   0x5   :  { %s2411_s10 = smov 0   ;;  %s2413_s11 = smov 0  }
   0x6 LB: > { %s1884_s12 = sadd.s32 4294967295, %s2383_s11   ;;  %s1885_s13 = sadd.s32 4294967294, %s2383_s11   ;;  %s2383_s11 = sphi %s2413_s11, %s17_s11   ;;  %s2379_s10 = sphi %s2411_s10, %s2877_s10   ;;  %s2375_s9 = sphi %s2409_s9, %s2876_s9   ;;  %s2371_s8 = sphi %s2407_s8, %s2875_s8   ;;  %s2367_s7 = sphi %s2405_s7, %s2874_s7   ;;  %s2363_s6 = sphi %s2403_s6, %s2873_s6  }
   0x7   : > { %s29_s14 = sadd.s32 1, %s2379_s10  ;;  %s38_s15 = sadd.s32 1, %s2371_s8 }
   0x8   : > { %p31_p0 = scmp.ge.s32.totalorder %s29_s14, 2  ;;  %p45_p1 = scmp.ne.s32.totalorder %s2371_s8, %s2367_s7 }
   0x9   : > { %p46_p2 = scmp.eq.s32.totalorder %s2383_s11, 0  ;;  %p51_p3 = scmp.ne.s32.totalorder %s2367_s7, %s2363_s6 }
   0xa   : > { %s2879_s14 = smov (%p31_p0, %s29_s14), 0  ;;  %p52_p5 = scmp.eq.s32.totalorder %s1884_s12, 0 }
   0xb   : > { %p2444_p4 = por %p46_p2, %p45_p1  ;;  %s33_s17 = ssub.s32 %s2379_s10, %s2879_s14 }
   0xc   : > { %p77_p6 = scmp.eq.s32.totalorder %s1884_s12, 1  ;;  %p36_p7 = scmp.eq.s32.totalorder %s33_s17, 0 }
   0xd   : > { %p2450_p8 = por %p52_p5, %p51_p3  ;;  %p83_p10 = scmp.eq.s32.totalorder %s1885_s13, 1 }
   0xe   : > { %p2454_p9 = por %p77_p6, %p45_p1  ;;  %p2219_p13 = scmp.lt.s32.totalorder %s2383_s11, 2 }
   0xf   : > { %s2459_s20 = scalar_select %p36_p7, %s2371_s8, %s38_s15  }
  0x10   : > { %p2461_p11 = por %p83_p10, %p51_p3  ;;  %s103_s22 = sand.u32 1, %s2371_s8  }
  0x11   : > { %s1888_s23 = sshll.u32 %s103_s22, 6  ;;  %s1977_s24 = sshll.u32 %s2379_s10, 10 }
  0x12   : > { %s115_s27 = scalar_lea.hbm %s2857_s0, %s1977_s24  ;;  %s107_s28 = scalar_lea.vmem [#allocation2], %s1888_s23 }
  0x13   : > { %s116_s29 = sshll.u32 %s107_s28, 4  ;;  %p2474_p0 = pnand %p2219_p13, %p2444_p4  ;;  %s117_s29 = int_to_ptr.vmem [resolvable:$true] %s116_s29 }
  0x14   : > { %p1891_p1 = scmp.ge.s32.totalorder %s2383_s11, 1  ;;  %s104_s2 = scalar_lea.sflag [#allocation3], %s103_s22 }
  0x15   : > { %p2277_p2 = pneg %p2474_p0  ;;  %s2288_s3 = scalar_lea.vmem %s117_s29, 1024 }
  0x16   : > { %p2289_p3 = scmp.ne.s32.totalorder %s117_s29, %s2288_s3  ;;  %s2385_s4 = smov [#allocation2]  }
  0x17   : > { %s2293_s5 = sshll.u32 %s2385_s4, 4  ;;  %s2294_s5 = int_to_ptr.vmem [resolvable:$false] %s2293_s5 }
  0x18   : > { %p2291_p5 = pnand %p2289_p3, %p2277_p2  ;;  %s2295_s12 = scalar_lea.vmem %s2294_s5, 2048 }
  0x19   : > { %p2296_p7 = scmp.lt.s32.totalorder %s117_s29, %s2294_s5  ;;  %p2297_p10 = scmp.lt.s32.totalorder %s2295_s12, %s2288_s3 }
  0x1a   : > { %p2292_p6 = pneg %p2291_p5 }
  0x1b   : > { %p2298_p12 = por %p2297_p10, %p2296_p7 }
  0x1d   : > { %p2299_p4 = pnand %p2298_p12, %p2292_p6 }
  0x1f   : > { %2302 = shalt.err (!%p2299_p4)
}
  0x20   : > { %s2386_s13 = smov 128   ;;  %s2387_s15 = smov 8  }
  0x21   : > { %2214 = dma.hbm_to_vmem [thread:$0]  (!%p2474_p0), %s115_s27, 1024, %s117_s29, %s104_s2, %s2386_s13, %s2386_s13, %s2387_s15  }
  0x22   : > { %p124_p13 = scmp.lt.s32.totalorder %s2383_s11, 3 }
  0x24   : > { %p125_p2 = pnand %p1891_p1, %p124_p13 }
  0x25   : > { %s2487_s16 = sand.u32 (!%p125_p2), 1, %s2367_s7  }
  0x26   : > { %128 = sbr.rel (%p125_p2) target bundleno = 714 (0x2ca), region = 24  ;;  %s1892_s17 = sshll.u32 (!%p125_p2), %s2487_s16, 6 }
  0x27   : > { %s131_s22 = scalar_lea.sflag (!%p125_p2), [#allocation3], %s2487_s16  ;;  %s2491_s23 = scalar_lea.vmem (!%p125_p2), [#allocation2], %s1892_s17 }
  0x2b   : > { %2354 = dma.done.wait (%p2450_p8), %s131_s22, 1024  }
  0x2c   : > { %2356 = vsyncadd (%p2450_p8), %s131_s22, 4294966272  ;;  %v153_v0 = vlaneseq  ;;  %v1894_v7 = vld [vmem:[%s2491_s23 + $0x10] sm:$0xff]  ;;  %v1895_v8 = vld [vmem:[%s2491_s23 + $0x18] sm:$0xff]  ;;  %vm205_vm0 = vcmask 130048   ;;  %v2388_v18 = vmov 1.0   ;;  %v2389_v37 = vmov 0.0  }
  0x2d   : > { %v190_v9 = vld [vmem:[%s2491_s23] sm:$0xff]  ;;  %v200_v11 = vpack.c.bf16 %v1895_v8, %v1894_v7  ;;  %v191_v12 = vld [vmem:[%s2491_s23 + $0x8] sm:$0xff]  ;;  %v1934_v48 = vld [vmem:[%s2491_s23 + $0x30] sm:$0xff]  ;;  %s1893_s18 = sshll.u32 %s2487_s16, 5  ;;  %vm1776_vm13 = vcmask 261120   ;;  %s1978_s26 = sshll.u32 %s2375_s9, 9 }
  0x2e   : > { %v2497_v1 = vshrl.u32 %v153_v0, 7  ;;  %v157_v4 = vand.u32 127, %v153_v0  ;;  %v195_v13 = vpack.c.bf16 %v191_v12, %v190_v9  ;;  %v1935_v49 = vld [vmem:[%s2491_s23 + $0x38] sm:$0xff]  ;;  %v1932_v58 = vld [vmem:[%s2491_s23 + $0x20] sm:$0xff]  ;;  %v1933_v59 = vld [vmem:[%s2491_s23 + $0x28] sm:$0xff]  ;;  %s152_s24 = scalar_lea.vmem [#allocation5], %s1893_s18  ;;  %s2807_s29 = scalar_lea.hbm %s2858_s1, %s1978_s26 }
  0x2f   : > { %v201_v16 = vunpack.c.l.bf16 %v200_v11  ;;  %v202_v17 = vunpack.c.h.bf16 %v200_v11  ;;  %v990_v56 = vpack.c.bf16 %v1935_v49, %v1934_v48  ;;  %v985_v63 = vpack.c.bf16 %v1933_v59, %v1932_v58  ;;  %s1797_s25 = sshll.u32 %s152_s24, 4  ;;  %s1782_s9 = scalar_lea.sflag [#allocation4], %s2487_s16  ;;  %s2801_s25 = int_to_ptr.vmem [resolvable:$true] %s1797_s25 }
  0x30   : > { %v2500_v2 = vadd.s32 8, %v2497_v1  ;;  %v158_v3 = vmul.u32 2, %v2497_v1  ;;  %v196_v19 = vunpack.c.l.bf16 %v195_v13  ;;  %v197_v20 = vunpack.c.h.bf16 %v195_v13  ;;  %s2303_s30 = scalar_lea.vmem %s2801_s25, 512  ;;  %s2390_s2 = smov [#allocation5]  }
  0x31   : > { %v203_v21 = vsub.f32 %v1894_v7, %v201_v16  ;;  %2067 = vmatprep.mubr.msk.f32.mxu1 %vm205_vm0, %v201_v16  ;;  %v204_v23 = vsub.f32 %v1895_v8, %v202_v17  ;;  %v2593_v36 = vmul.u32 2, %v157_v4  ;;  %v2605_v41 = vadd.s32 16, %v2497_v1  ;;  %p2304_p8 = scmp.ne.s32.totalorder %s2801_s25, %s2303_s30  ;;  %s2307_s3 = sshll.u32 %s2390_s2, 4  ;;  %s2308_s3 = int_to_ptr.vmem [resolvable:$false] %s2307_s3 }
  0x32   : > { %v159_v5 = vmul.u32 2, %v2500_v2  ;;  %v164_v6 = vadd.s32 1, %v158_v3  ;;  %v2533_v24 = vsub.f32 %v190_v9, %v196_v19  ;;  %v199_v25 = vsub.f32 %v191_v12, %v197_v20  ;;  %s2309_s4 = scalar_lea.vmem %s2308_s3, 1024  ;;  %p2310_p1 = scmp.lt.s32.totalorder %s2801_s25, %s2308_s3 }
  0x33   : > { %vm2541_vm4 = vcmp.eq.s32.totalorder %v157_v4, %v158_v3  ;;  %v373_v27 = vpack.c.bf16 %v204_v23, %v203_v21  ;;  %vm173_vm5 = vcmp.eq.s32.totalorder %v2497_v1, %v2593_v36  ;;  %vm174_vm6 = vcmp.eq.s32.totalorder %v2500_v2, %v2593_v36  ;;  %p2305_p12 = pnand %p2304_p8, %p2454_p9  ;;  %p2311_p3 = scmp.lt.s32.totalorder %s2309_s4, %s2303_s30 }
  0x34   : > { %v165_v10 = vadd.s32 1, %v159_v5  ;;  %vm2512_vm2 = vcmp.eq.s32.totalorder %v157_v4, %v164_v6  ;;  %vm2526_vm3 = vcmp.eq.s32.totalorder %v157_v4, %v159_v5  ;;  %v2553_v28 = vpack.c.bf16 %v199_v25, %v2533_v24 }
  0x35   : > { %v374_v29 = vunpack.c.l.bf16 %v373_v27  ;;  %v375_v30 = vunpack.c.h.bf16 %v373_v27  ;;  %v2598_v38 = vsel %vm173_vm5, 1.0, %v2389_v37  ;;  %v2610_v44 = vadd.s32 24, %v2497_v1  ;;  %p2306_p0 = pneg %p2305_p12  ;;  %p2312_p5 = por %p2311_p3, %p2310_p1 }
  0x36   : > { %vm2508_vm1 = vcmp.eq.s32.totalorder %v157_v4, %v165_v10  ;;  %v369_v31 = vunpack.c.l.bf16 %v2553_v28  ;;  %v370_v32 = vunpack.c.h.bf16 %v2553_v28  ;;  %vm175_vm7 = vcmp.eq.s32.totalorder %v2605_v41, %v2593_v36 }
  0x37   : > { %2063 = vmatprep.subr.msk.mxu1 %vm2508_vm1, %v2388_v18  ;;  %2077 = vmatprep.subr.msk.mxu0 %vm2508_vm1, %v2388_v18  ;;  %v2570_v33 = vsub.f32 %v203_v21, %v374_v29  ;;  %v2572_v34 = vsub.f32 %v204_v23, %v375_v30  ;;  %v2617_v51 = vsel %vm174_vm6, 1.0, %v2389_v37  ;;  %v2620_v53 = vsel %vm175_vm7, 1.0, %v2389_v37  ;;  %p2313_p6 = pnand %p2312_p5, %p2306_p0 }
  0x38   : > { %2064 = vmatpush3.msk.msra.mxu1 %vm2508_vm1, %v2388_v18  ;;  %2078 = vmatpush3.msk.msra.mxu0 %vm2508_vm1, %v2388_v18  ;;  %v2579_v35 = vsub.f32 %v199_v25, %v370_v32  ;;  %vm176_vm8 = vcmp.eq.s32.totalorder %v2610_v44, %v2593_v36  ;;  %v371_v61 = vsub.f32 %v2533_v24, %v369_v31  ;;  %v992_v62 = vunpack.c.h.bf16 %v990_v56 }
  0x39   : > { %2065 = vmatprep.subr.msk.mxu1 %vm2512_vm2, %v2388_v18  ;;  %2079 = vmatprep.subr.msk.mxu0 %vm2512_vm2, %v2388_v18  ;;  %v2631_v60 = vsel %vm176_vm8, 1.0, %v2389_v37  ;;  %v991_v0 = vunpack.c.l.bf16 %v990_v56  ;;  %v987_v4 = vunpack.c.h.bf16 %v985_v63  ;;  %v986_v6 = vunpack.c.l.bf16 %v985_v63 }
  0x3a   : > { %2066 = vmatpush3.msk.msra.mxu1 %vm2512_vm2, %v2388_v18  ;;  %2080 = vmatpush3.msk.msra.mxu0 %vm2512_vm2, %v2388_v18  ;;  %v994_v5 = vsub.f32 %v1935_v49, %v992_v62 }
  0x3b   : > { %2068 = vmatmul.mubr.msk.f32.vlgmr.msra.gmra.mxu1 %vm205_vm0, %v202_v17  ;;  %2070 = vmatprep.subr.msk.mxu1 %vm2526_vm3, %v2388_v18  ;;  %v993_v3 = vsub.f32 %v1934_v48, %v991_v0  ;;  %v988_v7 = vsub.f32 %v1932_v58, %v986_v6  ;;  %v989_v9 = vsub.f32 %v1933_v59, %v987_v4 }
  0x3c   : > { %2071 = vmatpush3.msk.msra.mxu1 %vm2526_vm3, %v2388_v18  ;;  %2074 = vmatprep.mubr.msk.f32.mxu1 %vm205_vm0, %v196_v19 }
  0x3d   : > { %2072 = vmatprep.subr.msk.mxu1 %vm2541_vm4, %v2388_v18  ;;  %2081 = vmatprep.mubr.msk.f32.mxu0 %vm205_vm0, %v374_v29  ;;  %v1263_v8 = vpack.c.bf16 %v994_v5, %v993_v3  ;;  %v1258_v11 = vpack.c.bf16 %v989_v9, %v988_v7 }
  0x3e   : > { %2073 = vmatpush3.msk.msra.mxu1 %vm2541_vm4, %v2388_v18  ;;  %2082 = vmatmul.mubr.msk.f32.vlgmr.msra.gmra.mxu0 %vm205_vm0, %v375_v30 }
  0x3f   : > { %2075 = vmatmul.mubr.msk.f32.vlgmr.msra.gmra.mxu1 %vm205_vm0, %v197_v20  ;;  %2084 = vmatprep.subr.msk.mxu1 %vm2526_vm3, %v2388_v18  ;;  %v1264_v10 = vunpack.c.l.bf16 %v1263_v8  ;;  %v1265_v12 = vunpack.c.h.bf16 %v1263_v8  ;;  %v1259_v13 = vunpack.c.l.bf16 %v1258_v11  ;;  %v1260_v16 = vunpack.c.h.bf16 %v1258_v11 }
  0x40   : > { %2085 = vmatpush3.msk.msra.mxu1 %vm2526_vm3, %v2388_v18  ;;  %2088 = vmatprep.mubr.msk.f32.mxu1 %vm205_vm0, %v369_v31 }
  0x41   : > { %2086 = vmatprep.subr.msk.mxu1 %vm2541_vm4, %v2388_v18  ;;  %2095 = vmatprep.mubr.msk.f32.mxu0 %vm205_vm0, %v2598_v38  ;;  %v1266_v17 = vsub.f32 %v993_v3, %v1264_v10  ;;  %v1267_v19 = vsub.f32 %v994_v5, %v1265_v12  ;;  %v1261_v20 = vsub.f32 %v988_v7, %v1259_v13 }
  0x42   : > { %2087 = vmatpush3.msk.msra.mxu1 %vm2541_vm4, %v2388_v18  ;;  %v1262_v21 = vsub.f32 %v989_v9, %v1260_v16 }
  0x43   : > { %2089 = vmatmul.mubr.msk.f32.vlgmr.msra.gmra.mxu1 %vm205_vm0, %v370_v32 }
  0x44   : > { %2105 = vmatprep.mubr.msk.f32.mxu1 %vm205_vm0, %v2598_v38 }
  0xfb   : > { %v2069_v39 = vpop.f32.mrf.mxu1 }
  0xfd   : > { %v278_v40 = vpop.f32.mrf.mxu1 }
  0xfe   : > { %v2083_v46 = vpop.f32.mrf.mxu0 }
  0xff   : > { %v2076_v42 = vpop.f32.mrf.mxu1 }
 0x100   : > { %v365_v43 = vadd.f32 %v2076_v42, %v2069_v39  ;;  %v450_v54 = vpop.f32.mrf.mxu0  ;;  %v181_v42 = vadd.s32 1, %v2593_v36 }
 0x101   : > { %v359_v45 = vpop.f32.mrf.mxu1 }
 0x102   : > { %v360_v47 = vadd.f32 %v359_v45, %v278_v40  ;;  %2101 = vmatprep.subr.mxu1 %v365_v43  ;;  %vm182_vm9 = vcmp.eq.s32.totalorder %v2497_v1, %v181_v42  ;;  %vm183_vm10 = vcmp.eq.s32.totalorder %v2500_v2, %v181_v42  ;;  %vm184_vm11 = vcmp.eq.s32.totalorder %v2605_v41, %v181_v42 }
 0x103   : > { %v2090_v50 = vpop.f32.mrf.mxu1  ;;  %2102 = vmatpush3.msra.mxu1 %v365_v43  ;;  %v186_v36 = vsel %vm182_vm9, 1.0, %v2389_v37  ;;  %vm185_vm12 = vcmp.eq.s32.totalorder %v2610_v44, %v181_v42 }
 0x104   : > { %v537_v52 = vadd.f32 %v2090_v50, %v2083_v46  ;;  %2103 = vmatprep.subr.mxu1 %v360_v47  ;;  %v187_v50 = vsel %vm183_vm10, 1.0, %v2389_v37  ;;  %v189_v41 = vsel %vm185_vm12, 1.0, %v2389_v37 }
 0x105   : > { %v531_v55 = vpop.f32.mrf.mxu1  ;;  %2104 = vmatpush3.msra.mxu1 %v360_v47 }
 0x106   : > { %v532_v57 = vadd.f32 %v531_v55, %v450_v54  ;;  %2091 = vmatprep.subr.mxu0 %v537_v52  ;;  %2106 = vmatmul.mubr.msk.f32.vlgmr.msra.gmra.mxu1 %vm205_vm0, %v2617_v51 }
 0x107   : > { %2092 = vmatpush3.msra.mxu0 %v537_v52  ;;  %2108 = vmatprep.mubr.msk.f32.mxu1 %vm205_vm0, %v2620_v53  ;;  %v188_v52 = vsel %vm184_vm11, 1.0, %v2389_v37 }
 0x108   : > { %2093 = vmatprep.subr.mxu0 %v532_v57  ;;  %2118 = vmatprep.subr.msk.mxu1 %vm2526_vm3, %v2388_v18 }
 0x109   : > { %2094 = vmatpush3.msra.mxu0 %v532_v57  ;;  %2119 = vmatpush3.msk.msra.mxu1 %vm2526_vm3, %v2388_v18 }
 0x10a   : > { %2096 = vmatmul.mubr.msk.f32.vlgmr.msra.gmra.mxu0 %vm205_vm0, %v2617_v51  ;;  %2109 = vmatmul.mubr.msk.f32.gmra.mxu1 %vm205_vm0, %v2631_v60 }
 0x10b   : > { %2111 = vmatprep.subr.msk.mxu0 %vm2508_vm1, %v2388_v18  ;;  %2120 = vmatprep.subr.msk.mxu1 %vm2541_vm4, %v2388_v18 }
 0x10c   : > { %2112 = vmatpush3.msk.msra.mxu0 %vm2508_vm1, %v2388_v18  ;;  %2098 = vmatprep.mubr.msk.f32.mxu0 %vm205_vm0, %v2620_v53 }
 0x10d   : > { %2121 = vmatpush3.msk.msra.mxu1 %vm2541_vm4, %v2388_v18  ;;  %2122 = vmatprep.mubr.msk.f32.mxu1 %vm205_vm0, %v371_v61 }
 0x10e   : > { %2099 = vmatmul.mubr.msk.f32.gmra.mxu0 %vm205_vm0, %v2631_v60  ;;  %2113 = vmatprep.subr.msk.mxu0 %vm2512_vm2, %v2388_v18 }
 0x10f   : > { %2123 = vmatmul.mubr.msk.f32.vlgmr.msra.gmra.mxu1 %vm205_vm0, %v2579_v35  ;;  %2135 = vmatprep.subr.msk.mxu1 %vm2508_vm1, %v2388_v18 }
 0x110   : > { %2114 = vmatpush3.msk.msra.mxu0 %vm2512_vm2, %v2388_v18  ;;  %2136 = vmatpush3.msk.msra.mxu1 %vm2508_vm1, %v2388_v18 }
 0x111   : > { %2137 = vmatprep.subr.msk.mxu1 %vm2512_vm2, %v2388_v18  ;;  %2115 = vmatprep.mubr.msk.f32.mxu0 %vm205_vm0, %v2570_v33 }
 0x112   : > { %2138 = vmatpush3.msk.msra.mxu1 %vm2512_vm2, %v2388_v18  ;;  %2139 = vmatprep.mubr.msk.f32.mxu1 %vm205_vm0, %v991_v0 }
 0x113   : > { %2116 = vmatmul.mubr.msk.f32.vlgmr.msra.gmra.mxu0 %vm205_vm0, %v2572_v34  ;;  %2140 = vmatmul.mubr.msk.f32.vlgmr.msra.gmra.mxu1 %vm205_vm0, %v992_v62 }
 0x114   : > { %2142 = vmatprep.subr.msk.mxu1 %vm2526_vm3, %v2388_v18  ;;  %2146 = vmatprep.mubr.msk.f32.mxu1 %vm205_vm0, %v986_v6 }
 0x115   : > { %2143 = vmatpush3.msk.msra.mxu1 %vm2526_vm3, %v2388_v18  ;;  %2129 = vmatprep.mubr.msk.f32.mxu0 %vm205_vm0, %v2598_v38 }
 0x116   : > { %2144 = vmatprep.subr.msk.mxu1 %vm2541_vm4, %v2388_v18 }
 0x117   : > { %2145 = vmatpush3.msk.msra.mxu1 %vm2541_vm4, %v2388_v18 }
 0x118   : > { %2147 = vmatmul.mubr.msk.f32.vlgmr.msra.gmra.mxu1 %vm205_vm0, %v987_v4  ;;  %2159 = vmatprep.subr.msk.mxu1 %vm2508_vm1, %v2388_v18 }
 0x119   : > { %2160 = vmatpush3.msk.msra.mxu1 %vm2508_vm1, %v2388_v18  ;;  %2163 = vmatprep.mubr.msk.f32.mxu1 %vm205_vm0, %v1264_v10 }
 0x11a   : > { %2161 = vmatprep.subr.msk.mxu1 %vm2512_vm2, %v2388_v18 }
 0x11b   : > { %2162 = vmatpush3.msk.msra.mxu1 %vm2512_vm2, %v2388_v18 }
 0x11c   : > { %2164 = vmatmul.mubr.msk.f32.vlgmr.msra.gmra.mxu1 %vm205_vm0, %v1265_v12  ;;  %2166 = vmatprep.subr.msk.mxu1 %vm2526_vm3, %v2388_v18 }
 0x11d   : > { %2167 = vmatpush3.msk.msra.mxu1 %vm2526_vm3, %v2388_v18  ;;  %2170 = vmatprep.mubr.msk.f32.mxu1 %vm205_vm0, %v1259_v13 }
 0x11e   : > { %2168 = vmatprep.subr.msk.mxu1 %vm2541_vm4, %v2388_v18 }
 0x11f   : > { %2169 = vmatpush3.msk.msra.mxu1 %vm2541_vm4, %v2388_v18 }
 0x120   : > { %2171 = vmatmul.mubr.msk.f32.vlgmr.msra.gmra.mxu1 %vm205_vm0, %v1260_v16  ;;  %2183 = vmatprep.subr.msk.mxu1 %vm2508_vm1, %v2388_v18 }
 0x121   : > { %2184 = vmatpush3.msk.msra.mxu1 %vm2508_vm1, %v2388_v18  ;;  %2187 = vmatprep.mubr.msk.f32.mxu1 %vm205_vm0, %v1266_v17 }
 0x122   : > { %2185 = vmatprep.subr.msk.mxu1 %vm2512_vm2, %v2388_v18 }
 0x123   : > { %2186 = vmatpush3.msk.msra.mxu1 %vm2512_vm2, %v2388_v18 }
 0x124   : > { %2188 = vmatmul.mubr.msk.f32.vlgmr.msra.gmra.mxu1 %vm205_vm0, %v1267_v19  ;;  %2190 = vmatprep.subr.msk.mxu1 %vm2526_vm3, %v2388_v18 }
 0x125   : > { %2191 = vmatpush3.msk.msra.mxu1 %vm2526_vm3, %v2388_v18  ;;  %2194 = vmatprep.mubr.msk.f32.mxu1 %vm205_vm0, %v1261_v20 }
 0x126   : > { %2192 = vmatprep.subr.msk.mxu1 %vm2541_vm4, %v2388_v18 }
 0x127   : > { %2193 = vmatpush3.msk.msra.mxu1 %vm2541_vm4, %v2388_v18 }
 0x128   : > { %2195 = vmatmul.mubr.msk.f32.vlgmr.msra.gmra.mxu1 %vm205_vm0, %v1262_v21 }
 0x1c6   : > { %v2107_v14 = vpop.f32.mrf.mxu1 }
 0x1c8   : > { %v703_v15 = vpop.f32.mrf.mxu1 }
 0x1ca   : > { %v2097_v23 = vpop.f32.mrf.mxu0  ;;  %v2110_v24 = vpop.f32.mrf.mxu1 }
 0x1cb   : > { %v2759_v25 = vadd.f32 %v2107_v14, %v2097_v23 }
 0x1cc   : > { %v618_v22 = vpop.f32.mrf.mxu0  ;;  %v713_v27 = vpop.f32.mrf.mxu1 }
 0x1cd   : > { %v2761_v28 = vadd.f32 %v703_v15, %v618_v22 }
 0x1ce   : > { %v2100_v29 = vpop.f32.mrf.mxu0 }
 0x1cf   : > { %v2763_v30 = vadd.f32 %v2110_v24, %v2100_v29  ;;  %v2124_v31 = vpop.f32.mrf.mxu1 }
 0x1d0   : > { %v628_v32 = vpop.f32.mrf.mxu0 }
 0x1d1   : > { %v2765_v33 = vadd.f32 %v713_v27, %v628_v32  ;;  %v881_v18 = vpop.f32.mrf.mxu1 }
 0x1d3   : > { %v2117_v26 = vpop.f32.mrf.mxu0  ;;  %v2141_v34 = vpop.f32.mrf.mxu1 }
 0x1d4   : > { %v887_v35 = vadd.f32 %v2124_v31, %v2117_v26 }
 0x1d5   : > { %v800_v38 = vpop.f32.mrf.mxu0  ;;  %v1067_v39 = vpop.f32.mrf.mxu1 }
 0x1d6   : > { %v882_v40 = vadd.f32 %v881_v18, %v800_v38  ;;  %2125 = vmatprep.subr.mxu0 %v887_v35 }
 0x1d7   : > { %2126 = vmatpush3.msra.mxu0 %v887_v35 }
 0x1d8   : > { %v2148_v43 = vpop.f32.mrf.mxu1  ;;  %2127 = vmatprep.subr.mxu0 %v882_v40 }
 0x1d9   : > { %v1154_v45 = vadd.f32 %v2148_v43, %v2141_v34  ;;  %2128 = vmatpush3.msra.mxu0 %v882_v40 }
 0x1da   : > { %v1148_v46 = vpop.f32.mrf.mxu1  ;;  %2130 = vmatmul.mubr.msk.f32.vlgmr.msra.gmra.mxu0 %vm205_vm0, %v2617_v51 }
 0x1db   : > { %v1149_v47 = vadd.f32 %v1148_v46, %v1067_v39  ;;  %2149 = vmatprep.subr.mxu0 %v1154_v45  ;;  %2132 = vmatprep.mubr.msk.f32.mxu0 %vm205_vm0, %v2620_v53 }
 0x1dc   : > { %2150 = vmatpush3.msra.mxu0 %v1154_v45  ;;  %v2165_v48 = vpop.f32.mrf.mxu1 }
 0x1dd   : > { %2151 = vmatprep.subr.mxu0 %v1149_v47 }
 0x1de   : > { %2152 = vmatpush3.msra.mxu0 %v1149_v47  ;;  %v1340_v49 = vpop.f32.mrf.mxu1 }
 0x1df   : > { %2133 = vmatmul.mubr.msk.f32.gmra.mxu0 %vm205_vm0, %v2631_v60 }
 0x1e0   : > { %v2172_v1 = vpop.f32.mrf.mxu1  ;;  %2153 = vmatprep.mubr.msk.f32.mxu0 %vm205_vm0, %v186_v36 }
 0x1e1   : > { %v1427_v51 = vadd.f32 %v2172_v1, %v2165_v48 }
 0x1e2   : > { %v1421_v53 = vpop.f32.mrf.mxu1 }
 0x1e3   : > { %v1422_v54 = vadd.f32 %v1421_v53, %v1340_v49  ;;  %2154 = vmatmul.mubr.msk.f32.vlgmr.msra.gmra.mxu0 %vm205_vm0, %v187_v50  ;;  %2173 = vmatprep.subr.mxu0 %v1427_v51 }
 0x1e4   : > { %2174 = vmatpush3.msra.mxu0 %v1427_v51  ;;  %v2189_v2 = vpop.f32.mrf.mxu1  ;;  %2156 = vmatprep.mubr.msk.f32.mxu0 %vm205_vm0, %v188_v52 }
 0x1e5   : > { %2175 = vmatprep.subr.mxu0 %v1422_v54 }
 0x1e6   : > { %2176 = vmatpush3.msra.mxu0 %v1422_v54  ;;  %v1597_v55 = vpop.f32.mrf.mxu1 }
 0x1e7   : > { %2157 = vmatmul.mubr.msk.f32.gmra.mxu0 %vm205_vm0, %v189_v41 }
 0x1e8   : > { %v2196_v56 = vpop.f32.mrf.mxu1  ;;  %2177 = vmatprep.mubr.msk.f32.mxu0 %vm205_vm0, %v186_v36 }
 0x1e9   : > { %v1684_v44 = vadd.f32 %v2196_v56, %v2189_v2 }
 0x1ea   : > { %v1678_v57 = vpop.f32.mrf.mxu1 }
 0x1eb   : > { %v1679_v58 = vadd.f32 %v1678_v57, %v1597_v55  ;;  %2178 = vmatmul.mubr.msk.f32.vlgmr.msra.gmra.mxu0 %vm205_vm0, %v187_v50  ;;  %2197 = vmatprep.subr.mxu0 %v1684_v44 }
 0x1ec   : > { %2198 = vmatpush3.msra.mxu0 %v1684_v44  ;;  %2180 = vmatprep.mubr.msk.f32.mxu0 %vm205_vm0, %v188_v52 }
 0x1ed   : > { %2199 = vmatprep.subr.mxu0 %v1679_v58 }
 0x1ee   : > { %2200 = vmatpush3.msra.mxu0 %v1679_v58 }
 0x1ef   : > { %2181 = vmatmul.mubr.msk.f32.gmra.mxu0 %vm205_vm0, %v189_v41 }
 0x1f0   : > { %2201 = vmatprep.mubr.msk.f32.mxu0 %vm205_vm0, %v186_v36 }
 0x1f3   : > { %2202 = vmatmul.mubr.msk.f32.vlgmr.msra.gmra.mxu0 %vm205_vm0, %v187_v50 }
 0x1f4   : > { %2204 = vmatprep.mubr.msk.f32.mxu0 %vm205_vm0, %v188_v52 }
 0x1f7   : > { %2205 = vmatmul.mubr.msk.f32.gmra.mxu0 %vm205_vm0, %v189_v41 }
 0x29a   : > { %v2131_v37 = vpop.f32.mrf.mxu0 }
 0x29b   : > { %v976_v6 = vadd.f32 %v2131_v37, %v2759_v25 }
 0x29c   : > { %v956_v59 = vpop.f32.mrf.mxu0 }
 0x29d   : > { %v975_v8 = vadd.f32 %v956_v59, %v2761_v28 }
 0x29f   : > { %v2134_v60 = vpop.f32.mrf.mxu0 }
 0x2a0   : > { %v978_v11 = vadd.f32 %v2134_v60, %v2763_v30 }
 0x2a1   : > { %v966_v61 = vpop.f32.mrf.mxu0 }
 0x2a2   : > { %v977_v17 = vadd.f32 %v966_v61, %v2765_v33 }
 0x2a3   : > { %v2155_v62 = vpop.f32.mrf.mxu0 }
 0x2a4   : > { %v1255_v9 = vadd.f32 %v2155_v62, %v976_v6 }
 0x2a5   : > { %v1235_v63 = vpop.f32.mrf.mxu0 }
 0x2a6   : > { %v1254_v12 = vadd.f32 %v1235_v63, %v975_v8 }
 0x2a7   : > { %v2158_v0 = vpop.f32.mrf.mxu0 }
 0x2a8   : > { %v1257_v19 = vadd.f32 %v2158_v0, %v978_v11 }
 0x2a9   : > { %v1245_v3 = vpop.f32.mrf.mxu0 }
 0x2aa   : > { %v1256_v15 = vadd.f32 %v1245_v3, %v977_v17 }
 0x2ab   : > { %v2179_v4 = vpop.f32.mrf.mxu0 }
 0x2ac   : > { %v1516_v13 = vadd.f32 %v2179_v4, %v1255_v9 }
 0x2ad   : > { %v1496_v5 = vpop.f32.mrf.mxu0 }
 0x2ae   : > { %v1515_v20 = vadd.f32 %v1496_v5, %v1254_v12 }
 0x2af   : > { %v2182_v7 = vpop.f32.mrf.mxu0 }
 0x2b0   : > { %v1518_v23 = vadd.f32 %v2182_v7, %v1257_v19 }
 0x2b1   : > { %v1506_v10 = vpop.f32.mrf.mxu0 }
 0x2b2   : > { %v1517_v22 = vadd.f32 %v1506_v10, %v1256_v15 }
 0x2b3   : > { %v2203_v16 = vpop.f32.mrf.mxu0 }
 0x2b4   : > { %v1773_v21 = vadd.f32 %v2203_v16, %v1516_v13 }
 0x2b5   : > { %v1753_v14 = vpop.f32.mrf.mxu0 }
 0x2b6   : > { %1778 = vst.msk [vmem:[%s152_s24 + $0x8] sm:$0xff] %vm1776_vm13, %v1773_v21  ;;  %v1772_v24 = vadd.f32 %v1753_v14, %v1515_v20 }
 0x2b7   : > { %v2206_v25 = vpop.f32.mrf.mxu0 }
 0x2b8   : > { %1777 = vst.msk [vmem:[%s152_s24] sm:$0xff] %vm1776_vm13, %v1772_v24  ;;  %v1775_v27 = vadd.f32 %v2206_v25, %v1518_v23 }
 0x2b9   : > { %v1763_v28 = vpop.f32.mrf.mxu0 }
 0x2ba   : > { %1780 = vst.msk [vmem:[%s152_s24 + $0x18] sm:$0xff] %vm1776_vm13, %v1775_v27  ;;  %v1774_v29 = vadd.f32 %v1763_v28, %v1517_v22 }
 0x2bc   : > { %1779 = vst.msk [vmem:[%s152_s24 + $0x10] sm:$0xff] %vm1776_vm13, %v1774_v29 }
 0x2bd   : > { %2316 = shalt.err (!%p2313_p6)
}
 0x2be   : > { %s2317_s5 = scalar_lea.hbm %s2807_s29, 512  ;;  %s2321_s15 = scalar_lea.hbm %s2858_s1, 1024 }
 0x2bf   : > { %p2318_p7 = scmp.ne.s32.totalorder %s2807_s29, %s2317_s5  ;;  %p2322_p13 = scmp.lt.s32.totalorder %s2807_s29, %s2858_s1 }
 0x2c0   : > { %p2323_p2 = scmp.lt.s32.totalorder %s2321_s15, %s2317_s5 }
 0x2c1   : > { %p2319_p10 = pnand %p2318_p7, %p2454_p9 }
 0x2c2   : > { %p2324_p8 = por %p2323_p2, %p2322_p13 }
 0x2c3   : > { %p2320_p4 = pneg %p2319_p10 }
 0x2c5   : > { %p2325_p12 = pnand %p2324_p8, %p2320_p4 }
 0x2c7   : > { %2328 = shalt.err (!%p2325_p12)
}
 0x2c8   : > { %s2391_s23 = smov 128   ;;  %s2392_s18 = smov 8  }
 0x2c9   : > { %2209 = dma.vmem_to_hbm [thread:$0]  (%p2454_p9), %s2801_s25, 512, %s2807_s29, %s1782_s9, %s2391_s23, %s2391_s23, %s2392_s18  }
 0x2ca PF: > { %s1812_s24 = sand.u32 1, %s2363_s6   ;;  %p2872_p0 = scmp.ge.s32.totalorder %s2383_s11, 2 }
 0x2cb   : > { %s1813_s26 = scalar_lea.sflag [#allocation4], %s1812_s24 }
 0x2cc   : > { %p2216_p1 = pnand %p2872_p0, %p2461_p11 }
 0x2ce   : > { %p2217_p3 = pneg %p2216_p1 }
 0x2d0   : > { %2358 = dma.done.wait (%p2217_p3), %s1813_s26, 512  }
 0x2d1   : > { %2360 = vsyncadd (%p2217_p3), %s1813_s26, 4294966784  ;;  %s17_s11 = sadd.s32 1, %s2383_s11   ;;  %s2873_s6 = smov %s2367_s7 }
 0x2d2   : > { %p14_p5 = scmp.ge.s32.totalorder %s17_s11, 4   ;;  %s2874_s7 = smov %s2371_s8 }
 0x2d3   : > { %s2875_s8 = smov %s2459_s20  ;;  %s2876_s9 = smov %s2379_s10 }
 0x2d4   : > { %s2877_s10 = smov %s2879_s14  ;;  %16 = sbr.rel (!%p14_p5) target bundleno = 6 (0x6), region = 72 }
 0x2d9   :  { %1818 = vsyncpa [#allocation3], 1 }
 0x2da   :  { %1820 = vsyncpa [#allocation3 + $0x1], 1 }
 0x2db   :  { %1821 = vsyncpa [#allocation4], 1 }
 0x2dc   :  { %1823 = vsyncpa [#allocation4 + $0x1], 1 }

</bundles_post_ra>
